<compile_context>
chip_gen: v5e
topology: v5e:2x2
jax: 0.10.0
libtpu: 0.0.40
codegen_flags: <defaults>
</compile_context>

<pallas_src>
import jax
import jax.numpy as jnp
from jax.experimental import pallas as pl
from jax.experimental.pallas import tpu as pltpu


def _inv_softmax_loss_kernel(adj_ref, logits_ref, labels_ref, out_ref):
    # adj_ref:    (1, C)  f32   log_prior - lambda * log_inverse_prior (VMEM-resident)
    # logits_ref: (T, C)  native dtype (bf16 / f32) row tile
    # labels_ref: (T, 1)  int32
    # out_ref:    (T, 1)  f32   per-sample NLL
    x = logits_ref[...].astype(jnp.float32) + adj_ref[...]             # (T, C)

    # pick x[label] (before the exp pass): one-hot via a (1, C) iota broadcast
    col = jax.lax.broadcasted_iota(jnp.int32, (1, x.shape[-1]), 1)      # (1, C)
    picked = jnp.sum(jnp.where(col == labels_ref[...], x, 0.0),
                     axis=-1, keepdims=True)                            # (T, 1)

    # numerically-stable log-sum-exp over the class axis
    m = jnp.max(x, axis=-1, keepdims=True)                              # (T, 1)
    lse = m + jnp.log(jnp.sum(jnp.exp(x - m), axis=-1, keepdims=True))  # (T, 1)

    out_ref[...] = lse - picked


def _round_up(x, m):
    return ((x + m - 1) // m) * m


def inverse_softmax_loss(logits, labels, class_counts, lambda_param=1.0,
                         tile_n=None):
    """Pallas TPU implementation of InverseSoftmaxLoss.forward.

    logits: (N, C) float32 or bfloat16 (streamed in native dtype)
    labels: (N,)   integer class ids
    class_counts: (C,) float
    """
    n, c = logits.shape
    class_counts = class_counts.astype(jnp.float32)

    # buffer setup (matches the PyTorch __init__), kept tiny and in f32
    prior = class_counts / jnp.sum(class_counts)
    inverse_prior = 1.0 / (prior + 1e-6)
    adjustment = (jnp.log(prior + 1e-6)
                  - lambda_param * jnp.log(inverse_prior + 1e-6)
                  ).reshape(1, c).astype(jnp.float32)

    labels2d = labels.astype(jnp.int32).reshape(n, 1)

    itemsize = jnp.dtype(logits.dtype).itemsize
    sublane = max(8, 32 // itemsize)          # f32 -> 8 rows, bf16 -> 16 rows

    # ---- VMEM-aware tile budget -------------------------------------------
    # Footprint per grid step ~= 2x logits tile (double buffer) + ~4x tile of
    # f32 temps in the body, so keep the logits tile at budget/6 of the space
    # we are willing to use.
    try:
        vmem_cap = int(pltpu.get_tpu_info().vmem_capacity_bytes)
    except Exception:
        vmem_cap = 64 * 1024 * 1024
    if vmem_cap >= 100 * 1024 * 1024:
        # v5e / v6e: 128 MiB physical VMEM -> bigger tiles, higher scoped limit
        budget_bytes, vmem_limit = 8 * 1024 * 1024, 64 * 1024 * 1024
    else:
        # v7x (64 MiB / TC) or unknown: stay conservative
        budget_bytes, vmem_limit = 3 * 1024 * 1024, 48 * 1024 * 1024

    if tile_n is None:
        tile_n = max(sublane, budget_bytes // (itemsize * c))
    tile_n = max(sublane, (int(tile_n) // sublane) * sublane)
    tile_n = min(tile_n, _round_up(n, sublane))
    if n >= 2 * sublane:
        # >= 2 grid steps so the "parallel" axis can shard across 2 TCs (v7x)
        tile_n = min(tile_n, _round_up(pl.cdiv(n, 2), sublane))
    num_tiles = pl.cdiv(n, tile_n)

    cost = pl.CostEstimate(
        flops=6 * n * c,
        transcendentals=n * c,
        bytes_accessed=itemsize * n * c + 4 * n + 4 * c + 4 * n,
    )

    per_sample = pl.pallas_call(
        _inv_softmax_loss_kernel,
        out_shape=jax.ShapeDtypeStruct((n, 1), jnp.float32),
        grid=(num_tiles,),
        in_specs=[
            # adjustment vector: same block every step -> stays VMEM-resident
            pl.BlockSpec((1, c), lambda i: (0, 0)),
            # row tile of logits, native dtype (ragged last tile handled by Pallas)
            pl.BlockSpec((tile_n, c), lambda i: (i, 0)),
            # row tile of labels
            pl.BlockSpec((tile_n, 1), lambda i: (i, 0)),
        ],
        out_specs=pl.BlockSpec((tile_n, 1), lambda i: (i, 0)),
        compiler_params=pltpu.CompilerParams(
            dimension_semantics=("parallel",),
            vmem_limit_bytes=vmem_limit,
        ),
        cost_estimate=cost,
    )(adjustment, logits, labels2d)

    # final reduction over N scalars in XLA
    return jnp.sum(per_sample[:, 0]) / jnp.float32(n)


def _reference(logits, labels, class_counts, lambda_param=1.0):
    class_counts = class_counts.astype(jnp.float32)
    prior = class_counts / jnp.sum(class_counts)
    inverse_prior = 1.0 / (prior + 1e-6)
    adj = logits.astype(jnp.float32) + jnp.log(prior + 1e-6)[None, :] \
        - lambda_param * jnp.log(inverse_prior + 1e-6)[None, :]
    logp = jax.nn.log_softmax(adj, axis=-1)
    nll = -jnp.take_along_axis(logp, labels[:, None], axis=-1)[:, 0]
    return jnp.mean(nll)


if __name__ == "__main__":
    key = jax.random.PRNGKey(0)

    # --- test 1: small f32, single tile ------------------------------------
    N, C = 8, 16
    k1, k2 = jax.random.split(key)
    logits = jax.random.normal(k1, (N, C), dtype=jnp.float32)
    labels = jax.random.randint(k2, (N,), 0, C, dtype=jnp.int32)
    class_counts = jnp.arange(1, C + 1, dtype=jnp.float32)

    loss = inverse_softmax_loss(logits, labels, class_counts, lambda_param=1.0)
    loss = jax.block_until_ready(loss)
    ref = _reference(logits, labels, class_counts, lambda_param=1.0)
    assert jnp.allclose(loss, ref, atol=1e-5, rtol=1e-5), (loss, ref)

    # --- test 2: bf16 logits, multi-tile grid, ragged last tile (no padding)
    N2, C2 = 37, 16
    k3, k4 = jax.random.split(k2)
    logits2 = jax.random.normal(k3, (N2, C2), dtype=jnp.float32).astype(jnp.bfloat16)
    labels2 = jax.random.randint(k4, (N2,), 0, C2, dtype=jnp.int32)
    class_counts2 = jnp.arange(1, C2 + 1, dtype=jnp.float32)

    loss2 = inverse_softmax_loss(logits2, labels2, class_counts2,
                                 lambda_param=0.5, tile_n=16)   # 3 tiles, ragged edge
    loss2 = jax.block_until_ready(loss2)
    ref2 = _reference(logits2, labels2, class_counts2, lambda_param=0.5)
    assert jnp.allclose(loss2, ref2, atol=1e-4, rtol=1e-4), (loss2, ref2)

    # --- test 3: default (byte-budget) tile sizing path, f32 ----------------
    N3, C3 = 48, 32
    k5, k6 = jax.random.split(k4)
    logits3 = jax.random.normal(k5, (N3, C3), dtype=jnp.float32)
    labels3 = jax.random.randint(k6, (N3,), 0, C3, dtype=jnp.int32)
    class_counts3 = jnp.arange(1, C3 + 1, dtype=jnp.float32)

    loss3 = inverse_softmax_loss(logits3, labels3, class_counts3, lambda_param=1.0)
    loss3 = jax.block_until_ready(loss3)
    ref3 = _reference(logits3, labels3, class_counts3, lambda_param=1.0)
    assert jnp.allclose(loss3, ref3, atol=1e-5, rtol=1e-5), (loss3, ref3)

    print("KERNEL_OK")
</pallas_src>

<mosaic_0001>
module attributes {stable_mosaic.version = 11 : i64} {
  func.func @_inv_softmax_loss_kernel(%arg0: i32, %arg1: memref<1x16xf32, #tpu.memory_space<vmem>>, %arg2: memref<8x16xf32, #tpu.memory_space<vmem>>, %arg3: memref<8x1xi32, #tpu.memory_space<vmem>>, %arg4: memref<8x1xf32, #tpu.memory_space<vmem>>) attributes {dimension_semantics = [#tpu.dimension_semantics<parallel>], iteration_bounds = array<i64: 1>, scalar_prefetch = 0 : i64, scratch_operands = 0 : i64, tpu.core_type = #tpu.core_type<tc>, window_params = [{pipeline_mode = #tpu.pipeline_mode<synchronous>, transform_indices = @transform_0, window_bounds = array<i64: 1, 16>}, {transform_indices = @transform_1, window_bounds = array<i64: 8, 16>}, {transform_indices = @transform_2, window_bounds = array<i64: 8, 1>}, {transform_indices = @transform_3, window_bounds = array<i64: 8, 1>}]} {
    %c0 = arith.constant 0 : index
    %c0_0 = arith.constant 0 : index
    %0 = vector.load %arg2[%c0, %c0_0] : memref<8x16xf32, #tpu.memory_space<vmem>>, vector<8x16xf32>
    %c0_1 = arith.constant 0 : index
    %c0_2 = arith.constant 0 : index
    %1 = vector.load %arg1[%c0_1, %c0_2] : memref<1x16xf32, #tpu.memory_space<vmem>>, vector<1x16xf32>
    %2 = vector.broadcast %1 : vector<1x16xf32> to vector<8x16xf32>
    %3 = arith.addf %0, %2 : vector<8x16xf32>
    %4 = tpu.iota {dimensions = array<i32: 1>} : vector<1x16xi32>
    %c0_3 = arith.constant 0 : index
    %c0_4 = arith.constant 0 : index
    %5 = vector.load %arg3[%c0_3, %c0_4] : memref<8x1xi32, #tpu.memory_space<vmem>>, vector<8x1xi32>
    %6 = vector.broadcast %4 : vector<1x16xi32> to vector<8x16xi32>
    %7 = vector.broadcast %5 : vector<8x1xi32> to vector<8x16xi32>
    %8 = arith.cmpi eq, %6, %7 : vector<8x16xi32>
    %cst = arith.constant 0.000000e+00 : f32
    %9 = vector.broadcast %cst : f32 to vector<8x16xf32>
    %10 = arith.select %8, %3, %9 : vector<8x16xi1>, vector<8x16xf32>
    %cst_5 = arith.constant dense<0.000000e+00> : vector<8xf32>
    %11 = vector.multi_reduction <add>, %10, %cst_5 [1] : vector<8x16xf32> to vector<8xf32>
    %12 = vector.shape_cast %11 : vector<8xf32> to vector<8x1xf32>
    %cst_6 = arith.constant dense<0xFF800000> : vector<8xf32>
    %13 = vector.multi_reduction <maximumf>, %3, %cst_6 [1] : vector<8x16xf32> to vector<8xf32>
    %14 = vector.shape_cast %13 : vector<8xf32> to vector<8x1xf32>
    %15 = vector.broadcast %14 : vector<8x1xf32> to vector<8x16xf32>
    %16 = arith.subf %3, %15 : vector<8x16xf32>
    %17 = math.exp %16 : vector<8x16xf32>
    %cst_7 = arith.constant dense<0.000000e+00> : vector<8xf32>
    %18 = vector.multi_reduction <add>, %17, %cst_7 [1] : vector<8x16xf32> to vector<8xf32>
    %19 = vector.shape_cast %18 : vector<8xf32> to vector<8x1xf32>
    %20 = math.log %19 : vector<8x1xf32>
    %21 = arith.addf %14, %20 : vector<8x1xf32>
    %22 = arith.subf %21, %12 : vector<8x1xf32>
    %c0_8 = arith.constant 0 : index
    %c0_9 = arith.constant 0 : index
    %23 = vector.load %arg4[%c0_8, %c0_9] : memref<8x1xf32, #tpu.memory_space<vmem>>, vector<8x1xf32>
    tpu.vector_store %arg4[%c0_8, %c0_9], %22 {strides = array<i32>} : memref<8x1xf32, #tpu.memory_space<vmem>>, vector<8x1xf32>,
    return
  }
  func.func @transform_0(%arg0: i32) -> (i32, i32) {
    %c0_i32 = arith.constant 0 : i32
    %c0_i32_0 = arith.constant 0 : i32
    %c0_i32_1 = arith.constant 0 : i32
    return %c0_i32, %c0_i32_0 : i32, i32
  }
  func.func @transform_1(%arg0: i32) -> (i32, i32) {
    %c0_i32 = arith.constant 0 : i32
    %c0_i32_0 = arith.constant 0 : i32
    return %arg0, %c0_i32 : i32, i32
  }
  func.func @transform_2(%arg0: i32) -> (i32, i32) {
    %c0_i32 = arith.constant 0 : i32
    %c0_i32_0 = arith.constant 0 : i32
    return %arg0, %c0_i32 : i32, i32
  }
  func.func @transform_3(%arg0: i32) -> (i32, i32) {
    %c0_i32 = arith.constant 0 : i32
    %c0_i32_0 = arith.constant 0 : i32
    return %arg0, %c0_i32 : i32, i32
  }
}

</mosaic_0001>

<bundles_post_ra>
// kernel: tpu_custom_call.1
= control target key start
LH: loop header
LB: loop body
LE: loop exit
PB: predicated region body
PF: predicated region fallthrough
CT: control target
= control target key end

     0   :  { %v58_v2 = vmov 0   ;;  %vm28_vm0 = vcmask 130048   ;;  %v20_v11 = vlaneseq  ;;  %vm45_vm2 = vcmask 7168   ;;  %s94_s0 = inlined_call_operand.vmem [shape: f32[1,16], index: 0, kind: input, shape index: {}]   ;;  %s95_s1 = inlined_call_operand.vmem [shape: f32[8,16], index: 1, kind: input, shape index: {}]   ;;  %s96_s2 = inlined_call_operand.vmem [shape: s32[8,1], index: 2, kind: input, shape index: {}]   ;;  %s97_s3 = inlined_call_operand.vmem [shape: f32[8,1], index: 3, kind: output, shape index: {}]  }
   0x1   :  { %v14_v0 = vld [vmem:[%s95_s1] sm:$0xff]  ;;  %52 = vset.pattern.permute.xlu0 %v58_v2 }
   0x2   :  { %v53_v1 = vld [vmem:[%s94_s0] ss:$0 sm:$0xff]  ;;  %v21_v12 = vand.u32 127, %v20_v11 }
   0x3   :  { %v19_v3 = vadd.f32 %v53_v1, %v14_v0  ;;  %v22_v5 = vld [vmem:[%s96_s2] sm:$0xff] }
   0x5   :  { %v32_v4 = vsel %vm28_vm0, %v19_v3, -inf }
   0x6   :  { %33 = vmax.xlane.f32.xlu0 %v32_v4 }
  0x1a   :  { %24 = vperm.xlu0 %52, %v22_v5  }
  0x79   :  { %v34_v6 = vpop.xlane.xlu0 %33 }
  0x7a   :  { %v35_v7 = vsub.f32 %v19_v3, %v34_v6 }
  0x7c   :  { %v36_v8 = vmul.f32 1.442695, %v35_v7 }
  0x7e   :  { %54 = vpow2.f32 %v36_v8 }
  0x84   :  { %v55_v9 = vpop.eup %54 }
  0x85   :  { %v38_v10 = vsel %vm28_vm0, %v55_v9, 0.0 }
  0x86   :  { %39 = vadd.xlane.f32.xlu1 %v38_v10 }
  0x8c   :  { %v25_v13 = vpop.permute.xlu0 %24 }
  0x8d   :  { %vm26_vm1 = vcmp.eq.s32.totalorder %v21_v12, %v25_v13 }
  0x8e   :  { %v27_v14 = vsel %vm26_vm1, %v19_v3, 0.0 }
  0x8f   :  { %v29_v15 = vsel %vm28_vm0, %v27_v14, 0.0 }
  0x90   :  { %30 = vadd.xlane.f32.xlu1 %v29_v15 }
  0xf9   :  { %v40_v16 = vpop.xlane.xlu1 %39 }
  0xfa   :  { %56 = vlog2.f32 %v40_v16 }
 0x100   :  { %v57_v17 = vpop.eup %56 }
 0x101   :  { %v42_v18 = vmul.f32 0.6931472, %v57_v17 }
 0x103   :  { %v43_v19 = vadd.f32 %v42_v18, %v34_v6  ;;  %v31_v20 = vpop.xlane.xlu1 %30 }
 0x105   :  { %v44_v21 = vsub.f32 %v43_v19, %v31_v20 }
 0x107   :  { %46 = vst.msk [vmem:[%s97_s3] sm:$0xff] %vm45_vm2, %v44_v21 }

</bundles_post_ra>
